<compile_context>
chip_gen: v5e
topology: v5e:2x2
jax: 0.10.0
libtpu: 0.0.40
codegen_flags: <defaults>
</compile_context>

<pallas_src>
import functools

import jax
import jax.numpy as jnp
from jax.experimental import pallas as pl
from jax.experimental.pallas import tpu as pltpu


def _attn_pool_kernel(x_ref, w1_ref, b1_ref, w2_ref, b2_ref, o_ref, *, t_valid):
    TB, T, H = x_ref.shape
    Hh = w1_ref.shape[1]

    # ---- Linear(H, H//2) + Tanh: one MXU matmul with M = TB*T rows.
    # W1 arrives already in the MXU dtype (bf16 by default); x is cast to match,
    # accumulation stays f32.
    x2d = x_ref[...].reshape(TB * T, H).astype(w1_ref.dtype)
    h = jnp.tanh(
        jnp.dot(x2d, w1_ref[...], preferred_element_type=jnp.float32)
        + b1_ref[...]                                   # (1, Hh) broadcast
    )                                                   # (TB*T, Hh) f32

    # ---- Linear(H//2, 1): lane-dense VPU multiply + lane reduce (no N=1 matmul).
    h3 = h.reshape(TB, T, Hh)
    scores = jnp.sum(h3 * w2_ref[...], axis=-1) + b2_ref[0]   # (TB, T), T on lanes

    # ---- mask padded sequence positions (static; compiled out when t_valid == T).
    if t_valid != T:
        t_ids = jax.lax.broadcasted_iota(jnp.int32, (TB, T), 1)
        scores = jnp.where(t_ids < t_valid, scores, -jnp.inf)

    # ---- softmax over the sequence axis (exact divide: denom is only (TB, 1)).
    m = jnp.max(scores, axis=-1, keepdims=True)
    e = jnp.exp(scores - m)
    attn = e / jnp.sum(e, axis=-1, keepdims=True)              # (TB, T) f32

    # ---- pooled[b, :] = sum_t attn[b, t] * x[b, t, :]
    # VPU multiply + sublane (XLU) reduce instead of TB separate M=1 MXU matmuls.
    # x is re-read here to keep its live range short.
    pooled = jnp.sum(attn[:, :, None] * x_ref[...].astype(jnp.float32), axis=1)
    o_ref[...] = pooled.astype(o_ref.dtype)                    # (TB, H) dense store


def _vmem_limit_bytes():
    """Per-generation scoped-VMEM limit (v5e/v6e: 128 MiB physical; v7x: 64 MiB)."""
    try:
        cap = int(getattr(pltpu.get_tpu_info(), "vmem_capacity_bytes"))
    except Exception:
        cap = 64 * 1024 * 1024            # conservative fallback (safe on v7x too)
    # ~75% of physical, capped; leaves headroom for Mosaic internal scratch.
    return min((cap * 3) // 4, 100 * 1024 * 1024)


def _choose_batch_block(B, T, H, Hh, x_itemsize, w_itemsize, vmem_limit):
    """Largest TB (multiple of 8, divisor of B) whose double-buffered working set
    fits the VMEM budget, preferring a grid of >= 2 steps (pipelining / megacore)."""

    def step_bytes(tb):
        x_blk = 2 * tb * T * H * x_itemsize                     # double-buffered input
        out_blk = 2 * tb * H * 4                                # double-buffered output
        w_blk = 2 * (H * Hh * w_itemsize + 2 * Hh * 4)          # W1 / b1 / W2 row
        interm = tb * T * Hh * 4 + tb * T * H * 4 + 2 * tb * T * 4  # h, attn*x, scores
        return x_blk + out_blk + w_blk + interm

    budget = (vmem_limit * 3) // 4
    cands = sorted([tb for tb in range(8, B + 1, 8) if B % tb == 0], reverse=True)
    if not cands:
        return B                        # no multiple-of-8 divisor: whole batch, 1 step
    for min_steps in (2, 1):            # prefer >= 2 grid steps
        for tb in cands:
            if B // tb >= min_steps and step_bytes(tb) <= budget:
                return tb
    return cands[-1]


def attention_pooling(features, w1, b1, w2, b2, *, matmul_dtype=jnp.bfloat16):
    """features: (B, T, H); w1: (H, H//2); b1: (H//2,); w2: (H//2, 1); b2: (1,).

    Returns attention-pooled features of shape (B, H), matching the PyTorch forward.
    """
    B, T, H = features.shape
    Hh = w1.shape[1]

    # Pad T to a multiple of 8 so batch/seq reshapes are layout-compatible merges
    # of the sublane axis; padded positions are masked before the softmax.
    T_pad = T if T % 8 == 0 else ((T + 7) // 8) * 8
    if T_pad != T:
        features = jnp.pad(features, ((0, 0), (0, T_pad - T), (0, 0)))

    vmem_limit = _vmem_limit_bytes()
    w1_c = w1.astype(matmul_dtype)      # bf16 by default: halves W1 DMA/VMEM, feeds MXU natively
    TB = _choose_batch_block(B, T_pad, H, Hh,
                             features.dtype.itemsize, w1_c.dtype.itemsize, vmem_limit)

    b1_2d = b1.reshape(1, Hh).astype(jnp.float32)
    w2_row = w2.reshape(1, Hh).astype(jnp.float32)   # (Hh,1) -> (1,Hh) row for VPU multiply
    b2_1d = b2.reshape(1).astype(jnp.float32)        # scalar; lives in SMEM

    kernel = functools.partial(_attn_pool_kernel, t_valid=T)

    out = pl.pallas_call(
        kernel,
        out_shape=jax.ShapeDtypeStruct((B, H), features.dtype),
        grid_spec=pltpu.PrefetchScalarGridSpec(
            num_scalar_prefetch=0,
            grid=(B // TB,),
            in_specs=[
                pl.BlockSpec((TB, T_pad, H), lambda b: (b, 0, 0)),     # features
                pl.BlockSpec((H, Hh), lambda b: (0, 0)),               # W1 (constant index -> fetched once)
                pl.BlockSpec((1, Hh), lambda b: (0, 0)),               # b1
                pl.BlockSpec((1, Hh), lambda b: (0, 0)),               # W2 row
                pl.BlockSpec(memory_space=pltpu.MemorySpace.SMEM),     # b2 scalar
            ],
            out_specs=pl.BlockSpec((TB, H), lambda b: (b, 0)),
        ),
        compiler_params=pltpu.CompilerParams(
            dimension_semantics=("parallel",),
            vmem_limit_bytes=vmem_limit,
        ),
    )(features, w1_c, b1_2d, w2_row, b2_1d)
    return out


def attention_pooling_ref(features, w1, b1, w2, b2):
    """Pure-JAX reference matching the PyTorch forward (full f32 precision)."""
    hp = jax.lax.Precision.HIGHEST
    h = jnp.tanh(jnp.dot(features, w1, precision=hp) + b1)    # (B, T, H//2)
    scores = jnp.dot(h, w2, precision=hp) + b2                # (B, T, 1)
    attn = jax.nn.softmax(scores, axis=1)                     # softmax over seq
    return jnp.sum(features * attn, axis=1)                   # (B, H)


if __name__ == "__main__":
    # Small shapes; B=16 so TB=8 gives a 2-step 'parallel' grid.
    B, T, H = 16, 8, 32
    Hh = H // 2

    key = jax.random.PRNGKey(0)
    k_x, k_w1, k_b1, k_w2, k_b2 = jax.random.split(key, 5)

    features = jax.random.normal(k_x, (B, T, H), dtype=jnp.float32)
    # Deterministic synthetic params (shapes of nn.Linear(H, H//2), nn.Linear(H//2, 1)).
    w1 = jax.random.normal(k_w1, (H, Hh), dtype=jnp.float32) * 0.1
    b1 = jax.random.normal(k_b1, (Hh,), dtype=jnp.float32) * 0.1
    w2 = jax.random.normal(k_w2, (Hh, 1), dtype=jnp.float32) * 0.1
    b2 = jax.random.normal(k_b2, (1,), dtype=jnp.float32) * 0.1

    out = attention_pooling(features, w1, b1, w2, b2)
    out = jax.block_until_ready(out)

    ref = attention_pooling_ref(features, w1, b1, w2, b2)
    assert out.shape == (B, H)
    # Tolerance covers the bf16 MXU inputs of the first Linear (f32 accumulate);
    # everything downstream (scores, softmax, pooled sum) is exact f32.
    assert jnp.allclose(out, ref, atol=2e-2, rtol=2e-2), "mismatch vs reference"

    print("KERNEL_OK")
</pallas_src>

<mosaic_0001>
module attributes {stable_mosaic.version = 11 : i64} {
  func.func @_attn_pool_kernel(%arg0: i32, %arg1: memref<8x8x32xf32, #tpu.memory_space<vmem>>, %arg2: memref<32x16xbf16, #tpu.memory_space<vmem>>, %arg3: memref<1x16xf32, #tpu.memory_space<vmem>>, %arg4: memref<1x16xf32, #tpu.memory_space<vmem>>, %arg5: memref<1xf32, #tpu.memory_space<smem>>, %arg6: memref<8x32xf32, #tpu.memory_space<vmem>>) attributes {dimension_semantics = [#tpu.dimension_semantics<parallel>], iteration_bounds = array<i64: 2>, scalar_prefetch = 0 : i64, scratch_operands = 0 : i64, tpu.core_type = #tpu.core_type<tc>, window_params = [{transform_indices = @transform_0, window_bounds = array<i64: 8, 8, 32>}, {pipeline_mode = #tpu.pipeline_mode<synchronous>, transform_indices = @transform_1, window_bounds = array<i64: 32, 16>}, {pipeline_mode = #tpu.pipeline_mode<synchronous>, transform_indices = @transform_2, window_bounds = array<i64: 1, 16>}, {pipeline_mode = #tpu.pipeline_mode<synchronous>, transform_indices = @transform_3, window_bounds = array<i64: 1, 16>}, {transform_indices = @transform_4, window_bounds = array<i64: 1>}, {transform_indices = @transform_5, window_bounds = array<i64: 8, 32>}]} {
    %c0 = arith.constant 0 : index
    %c0_0 = arith.constant 0 : index
    %c0_1 = arith.constant 0 : index
    %0 = vector.load %arg1[%c0, %c0_0, %c0_1] : memref<8x8x32xf32, #tpu.memory_space<vmem>>, vector<8x8x32xf32>
    %1 = vector.shape_cast %0 : vector<8x8x32xf32> to vector<64x32xf32>
    %2 = arith.truncf %1 : vector<64x32xf32> to vector<64x32xbf16>
    %c0_2 = arith.constant 0 : index
    %c0_3 = arith.constant 0 : index
    %3 = vector.load %arg2[%c0_2, %c0_3] : memref<32x16xbf16, #tpu.memory_space<vmem>>, vector<32x16xbf16>
    %cst = arith.constant dense<0.000000e+00> : vector<64x16xf32>
    %4 = tpu.matmul %2, %3, %cst {dimension_numbers = #tpu.dot_dimension_numbers<[1], [0], [0], [1], [0, 0, 1, 1], [], []>} : vector<64x32xbf16>, vector<32x16xbf16>, vector<64x16xf32> -> vector<64x16xf32>
    %c0_4 = arith.constant 0 : index
    %c0_5 = arith.constant 0 : index
    %5 = vector.load %arg3[%c0_4, %c0_5] : memref<1x16xf32, #tpu.memory_space<vmem>>, vector<1x16xf32>
    %6 = vector.broadcast %5 : vector<1x16xf32> to vector<64x16xf32>
    %7 = arith.addf %4, %6 : vector<64x16xf32>
    %8 = math.tanh %7 : vector<64x16xf32>
    %9 = vector.shape_cast %8 : vector<64x16xf32> to vector<8x8x16xf32>
    %c0_6 = arith.constant 0 : index
    %c0_7 = arith.constant 0 : index
    %10 = vector.load %arg4[%c0_6, %c0_7] : memref<1x16xf32, #tpu.memory_space<vmem>>, vector<1x16xf32>
    %11 = vector.shape_cast %10 : vector<1x16xf32> to vector<1x1x16xf32>
    %12 = vector.broadcast %11 : vector<1x1x16xf32> to vector<8x8x16xf32>
    %13 = arith.mulf %9, %12 : vector<8x8x16xf32>
    %cst_8 = arith.constant dense<0.000000e+00> : vector<8x8xf32>
    %14 = vector.multi_reduction <add>, %13, %cst_8 [2] : vector<8x8x16xf32> to vector<8x8xf32>
    %c0_9 = arith.constant 0 : index
    %15 = memref.load %arg5[%c0_9] : memref<1xf32, #tpu.memory_space<smem>>
    %16 = vector.broadcast %15 : f32 to vector<8x8xf32>
    %17 = arith.addf %14, %16 : vector<8x8xf32>
    %cst_10 = arith.constant dense<0xFF800000> : vector<8xf32>
    %18 = vector.multi_reduction <maximumf>, %17, %cst_10 [1] : vector<8x8xf32> to vector<8xf32>
    %19 = vector.shape_cast %18 : vector<8xf32> to vector<8x1xf32>
    %20 = vector.broadcast %19 : vector<8x1xf32> to vector<8x8xf32>
    %21 = arith.subf %17, %20 : vector<8x8xf32>
    %22 = math.exp %21 : vector<8x8xf32>
    %cst_11 = arith.constant dense<0.000000e+00> : vector<8xf32>
    %23 = vector.multi_reduction <add>, %22, %cst_11 [1] : vector<8x8xf32> to vector<8xf32>
    %24 = vector.shape_cast %23 : vector<8xf32> to vector<8x1xf32>
    %25 = vector.broadcast %24 : vector<8x1xf32> to vector<8x8xf32>
    %26 = arith.divf %22, %25 : vector<8x8xf32>
    %27 = vector.shape_cast %26 : vector<8x8xf32> to vector<8x8x1xf32>
    %c0_12 = arith.constant 0 : index
    %c0_13 = arith.constant 0 : index
    %c0_14 = arith.constant 0 : index
    %28 = vector.load %arg1[%c0_12, %c0_13, %c0_14] : memref<8x8x32xf32, #tpu.memory_space<vmem>>, vector<8x8x32xf32>
    %29 = vector.broadcast %27 : vector<8x8x1xf32> to vector<8x8x32xf32>
    %30 = arith.mulf %29, %28 : vector<8x8x32xf32>
    %cst_15 = arith.constant dense<0.000000e+00> : vector<8x32xf32>
    %31 = vector.multi_reduction <add>, %30, %cst_15 [1] : vector<8x8x32xf32> to vector<8x32xf32>
    %c0_16 = arith.constant 0 : index
    %c0_17 = arith.constant 0 : index
    %32 = vector.load %arg6[%c0_16, %c0_17] : memref<8x32xf32, #tpu.memory_space<vmem>>, vector<8x32xf32>
    tpu.vector_store %arg6[%c0_16, %c0_17], %31 {strides = array<i32>} : memref<8x32xf32, #tpu.memory_space<vmem>>, vector<8x32xf32>,
    return
  }
  func.func @transform_0(%arg0: i32) -> (i32, i32, i32) {
    %c0_i32 = arith.constant 0 : i32
    %c0_i32_0 = arith.constant 0 : i32
    %c0_i32_1 = arith.constant 0 : i32
    return %arg0, %c0_i32, %c0_i32_0 : i32, i32, i32
  }
  func.func @transform_1(%arg0: i32) -> (i32, i32) {
    %c0_i32 = arith.constant 0 : i32
    %c0_i32_0 = arith.constant 0 : i32
    %c0_i32_1 = arith.constant 0 : i32
    return %c0_i32, %c0_i32_0 : i32, i32
  }
  func.func @transform_2(%arg0: i32) -> (i32, i32) {
    %c0_i32 = arith.constant 0 : i32
    %c0_i32_0 = arith.constant 0 : i32
    %c0_i32_1 = arith.constant 0 : i32
    return %c0_i32, %c0_i32_0 : i32, i32
  }
  func.func @transform_3(%arg0: i32) -> (i32, i32) {
    %c0_i32 = arith.constant 0 : i32
    %c0_i32_0 = arith.constant 0 : i32
    %c0_i32_1 = arith.constant 0 : i32
    return %c0_i32, %c0_i32_0 : i32, i32
  }
  func.func @transform_4(%arg0: i32) -> i32 {
    %c0_i32 = arith.constant 0 : i32
    %c0_i32_0 = arith.constant 0 : i32
    return %c0_i32 : i32
  }
  func.func @transform_5(%arg0: i32) -> (i32, i32) {
    %c0_i32 = arith.constant 0 : i32
    %c0_i32_0 = arith.constant 0 : i32
    return %arg0, %c0_i32 : i32, i32
  }
}

</mosaic_0001>

<bundles_post_ra>
// kernel: tpu_custom_call.1
= control target key start
LH: loop header
LB: loop body
LE: loop exit
PB: predicated region body
PF: predicated region fallthrough
CT: control target
= control target key end

     0   :  { %s1488_s0 = inlined_call_operand.hbm [shape: f32[16,8,32], index: 0, kind: input, shape index: {}]   ;;  %s1489_s1 = inlined_call_operand.vmem [shape: bf16[32,16], index: 1, kind: input, shape index: {}]   ;;  %s1490_s2 = inlined_call_operand.vmem [shape: f32[1,16], index: 2, kind: input, shape index: {}]   ;;  %s1491_s3 = inlined_call_operand.vmem [shape: f32[1,16], index: 3, kind: input, shape index: {}]   ;;  %s1492_s4 = inlined_call_operand.<no memory space> [shape: f32[1], index: 4, kind: input, shape index: {}]   ;;  %s1493_s5 = inlined_call_operand.hbm [shape: f32[16,32], index: 5, kind: output, shape index: {}]  }
   0x1   :  { %10 = sst [smem:[#allocation2]] %s1492_s4 }
   0x2   :  { %11 = vsyncpa [#allocation4], 0 }
   0x3   :  { %13 = vsyncpa [#allocation4 + $0x1], 0 }
   0x4   :  { %14 = vsyncpa [#allocation5], 0 }
   0x5   :  { %16 = vsyncpa [#allocation5 + $0x1], 0  ;;  %s1120_s20 = smov 0   ;;  %s1122_s21 = smov 0  }
   0x6   :  { %s1124_s22 = smov 0   ;;  %s1126_s23 = smov 0  }
   0x7 LB: > { %s1141_s4 = sadd.s32 4294967295, %s1082_s23   ;;  %s850_s24 = sadd.s32 4294967294, %s1082_s23   ;;  %s1082_s23 = sphi %s1126_s23, %s1511_s23   ;;  %s1078_s22 = sphi %s1124_s22, %s1510_s22   ;;  %s1074_s21 = sphi %s1122_s21, %s1509_s21   ;;  %s1070_s20 = sphi %s1120_s20, %s1508_s20  }
   0x8   : > { %s1145_s25 = sadd.s32 1, %s1082_s23   ;;  %s29_s26 = sadd.s32 1, %s1078_s22 }
   0x9   : > { %s26_s27 = ssub.s32 %s1082_s23, %s1145_s25  ;;  %p36_p0 = scmp.ne.s32.totalorder %s1078_s22, %s1074_s21 }
   0xa   : > { %p27_p1 = scmp.eq.s32.totalorder %s26_s27, 0  ;;  %p37_p2 = scmp.eq.s32.totalorder %s1082_s23, 0 }
   0xb   : > { %p42_p3 = scmp.ne.s32.totalorder %s1074_s21, %s1070_s20  ;;  %p43_p4 = scmp.eq.s32.totalorder %s1141_s4, 0 }
   0xc   : > { %s1157_s28 = scalar_select %p27_p1, %s1078_s22, %s29_s26  }
   0xd   : > { %p1159_p5 = por %p37_p2, %p36_p0  ;;  %p1163_p6 = por %p43_p4, %p42_p3 }
   0xe   : > { %p150_p7 = scmp.eq.s32.totalorder %s1141_s4, 1  ;;  %p156_p8 = scmp.eq.s32.totalorder %s850_s24, 1 }
   0xf   : > { %p896_p10 = scmp.lt.s32.totalorder %s1082_s23, 2  ;;  %s188_s8 = sand.u32 1, %s1078_s22  }
  0x10   : > { %p1170_p11 = por %p150_p7, %p36_p0  ;;  %p1174_p12 = por %p156_p8, %p42_p3 }
  0x11   : > { %s875_s9 = sshll.u32 %s1082_s23, 6  ;;  %s853_s10 = sshll.u32 %s188_s8, 6 }
  0x12   : > { %s197_s13 = scalar_lea.hbm %s1488_s0, %s875_s9  ;;  %s192_s15 = scalar_lea.vmem [#allocation3], %s853_s10 }
  0x13   : > { %s198_s14 = sshll.u32 %s197_s13, 4  ;;  %s200_s16 = sshll.u32 %s192_s15, 4  ;;  %s199_s14 = int_to_ptr.hbm [resolvable:$true] %s198_s14  ;;  %s201_s16 = int_to_ptr.vmem [resolvable:$true] %s200_s16 }
  0x14   : > { %p1185_p13 = pnand %p896_p10, %p1159_p5  ;;  %p856_p0 = scmp.ge.s32.totalorder %s1082_s23, 1 }
  0x15   : > { %p208_p1 = scmp.lt.s32.totalorder %s1082_s23, 3  ;;  %s189_s18 = scalar_lea.sflag [#allocation4], %s188_s8 }
  0x16   : > { %s986_s19 = sshra.s32 %s199_s14, 4  ;;  %p990_p3 = pneg %p1185_p13  ;;  %s987_s19 = int_to_ptr.hbm [resolvable:$true] %s986_s19 }
  0x17   : > { %s988_s24 = scalar_lea.hbm %s987_s19, 64  ;;  %s993_s29 = scalar_lea.hbm %s1488_s0, 128 }
  0x18   : > { %p989_p2 = scmp.ne.s32.totalorder %s987_s19, %s988_s24  ;;  %p994_p5 = scmp.lt.s32.totalorder %s987_s19, %s1488_s0 }
  0x19   : > { %p995_p8 = scmp.lt.s32.totalorder %s993_s29, %s988_s24 }
  0x1a   : > { %p991_p4 = pnand %p990_p3, %p989_p2 }
  0x1b   : > { %p996_p10 = por %p995_p8, %p994_p5 }
  0x1c   : > { %p992_p7 = pneg %p991_p4 }
  0x1e   : > { %p997_p9 = pnand %p996_p10, %p992_p7 }
  0x20   : > { %1000 = shalt.err (!%p997_p9)
}
  0x21   : > { %s1084_s8 = smov 128   ;;  %s1085_s11 = smov 8  }
  0x22   : > { %891 = dma.hbm_to_vmem [thread:$0]  (!%p1185_p13), %s199_s14, 1024, %s201_s16, %s189_s18, %s1084_s8, %s1084_s8, %s1085_s11  }
  0x23   : > { %p209_p2 = pnand %p856_p0, %p208_p1 }
  0x24   : > { %s1206_s12 = sand.u32 (!%p209_p2), 1, %s1074_s21  }
  0x25   : > { %212 = sbr.rel (%p209_p2) target bundleno = 890 (0x37a), region = 40  ;;  %s857_s13 = sshll.u32 (!%p209_p2), %s1206_s12, 6 }
  0x26   : > { %s215_s15 = scalar_lea.sflag (!%p209_p2), [#allocation4], %s1206_s12  ;;  %s218_s19 = scalar_lea.vmem (!%p209_p2), [#allocation3], %s857_s13 }
  0x2a   : > { %1061 = dma.done.wait (%p1163_p6), %s215_s15, 1024  }
  0x2b   : > { %1063 = vsyncadd (%p1163_p6), %s215_s15, 4294966272  ;;  %v877_v0 = vld [vmem:[%s1489_s1 + $0x8] sm:$0xff]  ;;  %v876_v1 = vld [vmem:[%s1489_s1] sm:$0xff]  ;;  %vm280_vm0 = vcmask 261120   ;;  %vm342_vm1 = vcmask 130048   ;;  %s367_s29 = sld [smem:[#allocation2]]  ;;  %v385_v58 = vlaneseq }
  0x2c   : > { %v1220_v2 = vld [vmem:[%s218_s19] sm:$0xff]  ;;  %v1222_v3 = vld [vmem:[%s218_s19 + $0x8] sm:$0xff]  ;;  %v1224_v4 = vld [vmem:[%s218_s19 + $0x10] sm:$0xff]  ;;  %299 = vmatpush.bf16.msra.mxu0 %v877_v0  ;;  %878 = vmatpush.bf16.msra.mxu1 %v877_v0  ;;  %vm395_vm2 = vcmask 1041409   ;;  %vm397_vm3 = vcmask 1042434   ;;  %vm399_vm4 = vcmask 1043459  }
  0x2d   : > { %v1226_v5 = vld [vmem:[%s218_s19 + $0x18] sm:$0xff]  ;;  %v1228_v6 = vld [vmem:[%s218_s19 + $0x20] sm:$0xff]  ;;  %v1230_v7 = vld [vmem:[%s218_s19 + $0x28] sm:$0xff]  ;;  %879 = vmatpush.bf16.msra.mxu2 %v877_v0  ;;  %880 = vmatpush.bf16.msra.mxu3 %v877_v0  ;;  %v256_v10 = vpack.c.bf16 %v1222_v3, %v1220_v2  ;;  %v1262_v61 = vand.u32 127, %v385_v58  ;;  %vm401_vm5 = vcmask 1044484   ;;  %vm403_vm6 = vcmask 1045509  }
  0x2e   : > { %v1232_v8 = vld [vmem:[%s218_s19 + $0x30] sm:$0xff]  ;;  %v1234_v9 = vld [vmem:[%s218_s19 + $0x38] sm:$0xff]  ;;  %v257_v11 = vpack.c.bf16 %v1226_v5, %v1224_v4  ;;  %v258_v12 = vpack.c.bf16 %v1230_v7, %v1228_v6  ;;  %v936_v14 = vld [vmem:[%s1490_s2] ss:$0 sm:$0xff]  ;;  %vm1495_vm7 = vcmask 1046534   ;;  %vm1494_vm8 = vcmask 1047559  }
  0x2f   : > { %v259_v13 = vpack.c.bf16 %v1234_v9, %v1232_v8  ;;  %v937_v19 = vld [vmem:[%s1491_s3] ss:$0 sm:$0xff]  ;;  %vm410_vm9 = vcmask 64512   ;;  %s858_s9 = sshll.u32 %s1206_s12, 3  ;;  %s872_s10 = sshll.u32 %s1141_s4, 3 }
  0x30   : > { %300 = vmatpush.bf16.msra.mxu0 %v876_v1  ;;  %881 = vmatpush.bf16.msra.mxu1 %v876_v1  ;;  %s775_s13 = scalar_lea.hbm %s1493_s5, %s872_s10  ;;  %s245_s4 = scalar_lea.vmem [#allocation6], %s858_s9 }
  0x31   : > { %882 = vmatpush.bf16.msra.mxu2 %v876_v1  ;;  %883 = vmatpush.bf16.msra.mxu3 %v876_v1  ;;  %v368_v59 = vstv %s367_s29  ;;  %s777_s15 = sshll.u32 %s245_s4, 4  ;;  %s779_s19 = sshll.u32 %s775_s13, 4  ;;  %s778_s15 = int_to_ptr.vmem [resolvable:$true] %s777_s15  ;;  %s780_s19 = int_to_ptr.hbm [resolvable:$true] %s779_s19 }
  0x32   : > { %s765_s17 = scalar_lea.sflag [#allocation5], %s1206_s12  ;;  %s1030_s14 = sshra.s32 %s780_s19, 4  ;;  %s1031_s14 = int_to_ptr.hbm [resolvable:$true] %s1030_s14 }
  0x33   : > { %867 = vmatmul.msk.bf16.vlgmr.msra.gmra.mxu0 %vm280_vm0, %v256_v10  ;;  %868 = vmatmul.msk.bf16.vlgmr.msra.gmra.mxu1 %vm280_vm0, %v257_v11  ;;  %s1032_s16 = scalar_lea.hbm %s1031_s14, 8  ;;  %s1036_s24 = scalar_lea.hbm %s1493_s5, 16 }
  0x34   : > { %869 = vmatmul.msk.bf16.vlgmr.msra.gmra.mxu2 %vm280_vm0, %v258_v12  ;;  %870 = vmatmul.msk.bf16.vlgmr.msra.gmra.mxu3 %vm280_vm0, %v259_v13  ;;  %p1033_p6 = scmp.ne.s32.totalorder %s1031_s14, %s1032_s16  ;;  %p1037_p0 = scmp.lt.s32.totalorder %s1031_s14, %s1493_s5 }
  0x35   : > { %p1038_p1 = scmp.lt.s32.totalorder %s1036_s24, %s1032_s16 }
  0x36   : > { %p1034_p9 = pnand %p1033_p6, %p1170_p11 }
  0x37   : > { %p1039_p3 = por %p1038_p1, %p1037_p0 }
  0x38   : > { %p1035_p13 = pneg %p1034_p9 }
  0x3a   : > { %p1040_p4 = pnand %p1039_p3, %p1035_p13 }
  0xb0   : > { %v302_v15 = vpop.f32.mrf.mxu0  ;;  %v307_v16 = vpop.f32.mrf.mxu1 }
  0xb1   : > { %v303_v17 = vadd.f32 %v936_v14, %v302_v15  ;;  %v308_v18 = vadd.f32 %v936_v14, %v307_v16 }
  0xb3   : > { %938 = vtanh.f32 %v303_v17 }
  0xb4   : > { %940 = vtanh.f32 %v308_v18 }
  0xb7   : > { %v312_v20 = vpop.f32.mrf.mxu2  ;;  %v317_v21 = vpop.f32.mrf.mxu3 }
  0xb8   : > { %v313_v22 = vadd.f32 %v936_v14, %v312_v20  ;;  %v304_v23 = vpop.f32.mrf.mxu0  ;;  %v309_v24 = vpop.f32.mrf.mxu1  ;;  %v318_v31 = vadd.f32 %v936_v14, %v317_v21 }
  0xb9   : > { %v939_v25 = vpop.eup %938  ;;  %v305_v26 = vadd.f32 %v936_v14, %v304_v23  ;;  %v310_v27 = vadd.f32 %v936_v14, %v309_v24 }
  0xba   : > { %v941_v28 = vpop.eup %940  ;;  %942 = vtanh.f32 %v313_v22  ;;  %v334_v29 = vmul.f32 %v939_v25, %v937_v19 }
  0xbb   : > { %v336_v30 = vmul.f32 %v941_v28, %v937_v19  ;;  %944 = vtanh.f32 %v305_v26 }
  0xbc   : > { %v343_v32 = vsel %vm342_vm1, %v334_v29, 0.0  ;;  %946 = vtanh.f32 %v310_v27 }
  0xbd   : > { %v349_v33 = vsel %vm342_vm1, %v336_v30, 0.0  ;;  %344 = vadd.xlane.f32.xlu0 %v343_v32  ;;  %948 = vtanh.f32 %v318_v31 }
  0xbe   : > { %350 = vadd.xlane.f32.xlu1 %v349_v33 }
  0xbf   : > { %v314_v34 = vpop.f32.mrf.mxu2  ;;  %v319_v35 = vpop.f32.mrf.mxu3 }
  0xc0   : > { %v943_v36 = vpop.eup %942  ;;  %v315_v37 = vadd.f32 %v936_v14, %v314_v34  ;;  %v320_v38 = vadd.f32 %v936_v14, %v319_v35  ;;  %v1086_v35 = vmov 0  }
  0xc1   : > { %v338_v39 = vmul.f32 %v943_v36, %v937_v19  ;;  %v945_v40 = vpop.eup %944  ;;  %935 = vset.pattern.permute.xlu2 %v1086_v35  ;;  %934 = vset.pattern.permute.xlu1 %v1086_v35 }
  0xc2   : > { %950 = vtanh.f32 %v315_v37  ;;  %v947_v41 = vpop.eup %946  ;;  %v335_v43 = vmul.f32 %v945_v40, %v937_v19  ;;  %933 = vset.pattern.permute.xlu0 %v1086_v35 }
  0xc3   : > { %952 = vtanh.f32 %v320_v38  ;;  %v355_v42 = vsel %vm342_vm1, %v338_v39, 0.0  ;;  %v337_v44 = vmul.f32 %v947_v41, %v937_v19  ;;  %v949_v46 = vpop.eup %948 }
  0xc4   : > { %356 = vadd.xlane.f32.xlu2 %v355_v42  ;;  %v346_v45 = vsel %vm342_vm1, %v335_v43, 0.0  ;;  %v340_v51 = vmul.f32 %v949_v46, %v937_v19 }
  0xc5   : > { %v352_v47 = vsel %vm342_vm1, %v337_v44, 0.0  ;;  %347 = vadd.xlane.f32.xlu0 %v346_v45 }
  0xc6   : > { %353 = vadd.xlane.f32.xlu1 %v352_v47  ;;  %v361_v54 = vsel %vm342_vm1, %v340_v51, 0.0 }
  0xc8   : > { %v951_v48 = vpop.eup %950 }
  0xc9   : > { %v953_v49 = vpop.eup %952  ;;  %v339_v50 = vmul.f32 %v951_v48, %v937_v19 }
  0xca   : > { %v341_v52 = vmul.f32 %v953_v49, %v937_v19 }
  0xcb   : > { %v358_v53 = vsel %vm342_vm1, %v339_v50, 0.0 }
  0xcc   : > { %359 = vadd.xlane.f32.xlu2 %v358_v53  ;;  %v364_v55 = vsel %vm342_vm1, %v341_v52, 0.0 }
  0xcd   : > { %362 = vadd.xlane.f32.xlu0 %v361_v54 }
  0xce   : > { %365 = vadd.xlane.f32.xlu1 %v364_v55 }
 0x130   : > { %v345_v56 = vpop.xlane.xlu0 %344 }
 0x131   : > { %v351_v57 = vpop.xlane.xlu1 %350  ;;  %v369_v62 = vadd.f32 %v368_v59, %v345_v56 }
 0x132   : > { %v371_v63 = vadd.f32 %v368_v59, %v351_v57 }
 0x133   : > { %v387_v12 = vperm.slane %v369_v62, %v1262_v61 }
 0x134   : > { %v389_v14 = vperm.slane %v371_v63, %v1262_v61 }
 0x137   : > { %v357_v60 = vpop.xlane.xlu2 %356 }
 0x138   : > { %v348_v0 = vpop.xlane.xlu0 %347  ;;  %v373_v15 = vadd.f32 %v368_v59, %v357_v60 }
 0x139   : > { %v354_v1 = vpop.xlane.xlu1 %353  ;;  %v370_v10 = vadd.f32 %v368_v59, %v348_v0 }
 0x13a   : > { %v372_v11 = vadd.f32 %v368_v59, %v354_v1  ;;  %v391_v22 = vperm.slane %v373_v15, %v1262_v61 }
 0x13b   : > { %v388_v13 = vperm.slane %v370_v10, %v1262_v61 }
 0x13c   : > { %v390_v16 = vperm.slane %v372_v11, %v1262_v61 }
 0x13d   : > { %v396_v17 = vsel %vm395_vm2, %v388_v13, %v387_v12 }
 0x13e   : > { %v398_v18 = vsel %vm397_vm3, %v389_v14, %v396_v17 }
 0x13f   : > { %v360_v19 = vpop.xlane.xlu2 %359  ;;  %v400_v21 = vsel %vm399_vm4, %v390_v16, %v398_v18 }
 0x140   : > { %v374_v20 = vadd.f32 %v368_v59, %v360_v19  ;;  %v363_v23 = vpop.xlane.xlu0 %362  ;;  %v402_v28 = vsel %vm401_vm5, %v391_v22, %v400_v21 }
 0x141   : > { %v366_v25 = vpop.xlane.xlu1 %365  ;;  %v375_v26 = vadd.f32 %v368_v59, %v363_v23 }
 0x142   : > { %v392_v24 = vperm.slane %v374_v20, %v1262_v61  ;;  %v376_v27 = vadd.f32 %v368_v59, %v366_v25 }
 0x143   : > { %v393_v29 = vperm.slane %v375_v26, %v1262_v61 }
 0x144   : > { %v404_v30 = vsel %vm403_vm6, %v392_v24, %v402_v28  ;;  %v394_v31 = vperm.slane %v376_v27, %v1262_v61 }
 0x145   : > { %v406_v32 = vsel %vm1495_vm7, %v393_v29, %v404_v30 }
 0x146   : > { %v408_v33 = vsel %vm1494_vm8, %v394_v31, %v406_v32 }
 0x147   : > { %v411_v34 = vsel %vm410_vm9, %v408_v33, -inf }
 0x148   : > { %412 = vmax.xlane.f32.xlu2 %v411_v34 }
 0x1bb   : > { %v413_v36 = vpop.xlane.xlu2 %412 }
 0x1bc   : > { %v417_v37 = vperm.slane %v413_v36, 2  ;;  %v416_v38 = vperm.slane %v413_v36, 1  ;;  %v415_v39 = vperm.slane %v413_v36, 0  ;;  %v418_v43 = vperm.slane %v413_v36, 3 }
 0x1bd   : > { %v419_v44 = vperm.slane %v413_v36, 4  ;;  %v422_v45 = vperm.slane %v413_v36, 7  ;;  %v420_v53 = vperm.slane %v413_v36, 5  ;;  %v421_v55 = vperm.slane %v413_v36, 6 }
 0x1be   : > { %v433_v40 = vsub.f32 %v371_v63, %v417_v37  ;;  %v432_v41 = vsub.f32 %v370_v10, %v416_v38  ;;  %v431_v42 = vsub.f32 %v369_v62, %v415_v39  ;;  %v434_v49 = vsub.f32 %v372_v11, %v418_v43 }
 0x1bf   : > { %v435_v50 = vsub.f32 %v373_v15, %v419_v44  ;;  %v438_v51 = vsub.f32 %v376_v27, %v422_v45  ;;  %v436_v60 = vsub.f32 %v374_v20, %v420_v53  ;;  %v437_v62 = vsub.f32 %v375_v26, %v421_v55 }
 0x1c0   : > { %v443_v46 = vmul.f32 1.442695, %v433_v40  ;;  %v441_v47 = vmul.f32 1.442695, %v432_v41  ;;  %v439_v48 = vmul.f32 1.442695, %v431_v42 }
 0x1c1   : > { %v445_v52 = vmul.f32 1.442695, %v434_v49  ;;  %v447_v54 = vmul.f32 1.442695, %v435_v50  ;;  %v453_v57 = vmul.f32 1.442695, %v438_v51 }
 0x1c2   : > { %954 = vpow2.f32 %v443_v46  ;;  %v449_v63 = vmul.f32 1.442695, %v436_v60  ;;  %v451_v0 = vmul.f32 1.442695, %v437_v62 }
 0x1c3   : > { %956 = vpow2.f32 %v441_v47 }
 0x1c4   : > { %958 = vpow2.f32 %v439_v48 }
 0x1c5   : > { %960 = vpow2.f32 %v445_v52 }
 0x1c6   : > { %962 = vpow2.f32 %v447_v54 }
 0x1c7   : > { %964 = vpow2.f32 %v453_v57 }
 0x1c8   : > { %v1280_v56 = vpop.eup %954  ;;  %966 = vpow2.f32 %v449_v63 }
 0x1c9   : > { %v1282_v58 = vpop.eup %956  ;;  %470 = vperm.xlu2 %935, %v1280_v56   ;;  %968 = vpow2.f32 %v451_v0 }
 0x1ca   : > { %v1285_v59 = vpop.eup %958  ;;  %467 = vperm.xlu1 %934, %v1282_v58  }
 0x1cb   : > { %464 = vperm.xlu0 %933, %v1285_v59   ;;  %v1289_v1 = vpop.eup %960 }
 0x1cc   : > { %v1291_v10 = vpop.eup %962 }
 0x1cd   : > { %v1294_v11 = vpop.eup %964 }
 0x1ce   : > { %v1298_v12 = vpop.eup %966 }
 0x1cf   : > { %v1300_v13 = vpop.eup %968 }
 0x1d1   : > { %473 = vperm.xlu2 %935, %v1289_v1  }
 0x1d2   : > { %476 = vperm.xlu1 %934, %v1291_v10  }
 0x1d3   : > { %485 = vperm.xlu0 %933, %v1294_v11  }
 0x1d9   : > { %479 = vperm.xlu2 %935, %v1298_v12  }
 0x1da   : > { %482 = vperm.xlu1 %934, %v1300_v13  }
 0x223   : > { %v471_v14 = vpop.permute.xlu2 %470 }
 0x224   : > { %v489_v22 = vperm.slane %v471_v14, %v1262_v61 }
 0x22b   : > { %v474_v17 = vpop.permute.xlu2 %473 }
 0x22c   : > { %v490_v25 = vperm.slane %v474_v17, %v1262_v61 }
 0x233   : > { %v480_v26 = vpop.permute.xlu2 %479 }
 0x234   : > { %v492_v30 = vperm.slane %v480_v26, %v1262_v61 }
 0x23c   : > { %v468_v15 = vpop.permute.xlu1 %467 }
 0x23d   : > { %v465_v16 = vpop.permute.xlu0 %464  ;;  %v488_v18 = vperm.slane %v468_v15, %v1262_v61 }
 0x23e   : > { %v487_v19 = vperm.slane %v465_v16, %v1262_v61 }
 0x240   : > { %v495_v20 = vsel %vm395_vm2, %v488_v18, %v487_v19 }
 0x241   : > { %v496_v23 = vsel %vm397_vm3, %v489_v22, %v495_v20 }
 0x242   : > { %v497_v27 = vsel %vm399_vm4, %v490_v25, %v496_v23 }
 0x244   : > { %v477_v21 = vpop.permute.xlu1 %476 }
 0x245   : > { %v491_v24 = vperm.slane %v477_v21, %v1262_v61  ;;  %v486_v29 = vpop.permute.xlu0 %485 }
 0x246   : > { %v494_v33 = vperm.slane %v486_v29, %v1262_v61 }
 0x247   : > { %v498_v28 = vsel %vm401_vm5, %v491_v24, %v497_v27 }
 0x248   : > { %v499_v34 = vsel %vm403_vm6, %v492_v30, %v498_v28 }
 0x24c   : > { %v483_v31 = vpop.permute.xlu1 %482 }
 0x24d   : > { %v493_v32 = vperm.slane %v483_v31, %v1262_v61 }
 0x24f   : > { %v500_v35 = vsel %vm1495_vm7, %v493_v32, %v499_v34 }
 0x250   : > { %v501_v36 = vsel %vm1494_vm8, %v494_v33, %v500_v35 }
 0x251   : > { %v503_v37 = vsel %vm410_vm9, %v501_v36, 0.0 }
 0x252   : > { %504 = vadd.xlane.f32.xlu2 %v503_v37 }
 0x2c5   : > { %v505_v38 = vpop.xlane.xlu2 %504 }
 0x2c6   : > { %v507_v39 = vperm.slane %v505_v38, 0  ;;  %v508_v40 = vperm.slane %v505_v38, 1  ;;  %v1320_v41 = vperm.slane %v505_v38, 2  ;;  %v1322_v42 = vperm.slane %v505_v38, 3 }
 0x2c7   : > { %v1324_v43 = vperm.slane %v505_v38, 4  ;;  %v1326_v61 = vperm.slane %v505_v38, 5  ;;  %v1332_v48 = vperm.slane %v505_v38, 7  ;;  %v1334_v51 = vperm.slane %v505_v38, 6 }
 0x2c8   : > { %970 = vrcp.f32 %v507_v39  ;;  %v547_v44 = vand.u32 2147483647, %v508_v40  ;;  %v549_v45 = vand.u32 2147483648, %v508_v40  ;;  %v532_v46 = vand.u32 2147483647, %v507_v39 }
 0x2c9   : > { %972 = vrcp.f32 %v508_v40  ;;  %v534_v49 = vand.u32 2147483648, %v507_v39  ;;  %vm543_vm10 = vweird.f32 %v508_v40  ;;  %vm528_vm12 = vweird.f32 %v507_v39 }
 0x2ca   : > { %974 = vrcp.f32 %v1320_v41  ;;  %vm1338_vm11 = vcmp.eq.f32.partialorder %v547_v44, 8.507059e+37  ;;  %v550_v60 = vor.u32 1.1754944e-38, %v549_v45  ;;  %vm1344_vm13 = vcmp.eq.f32.partialorder %v532_v46, 8.507059e+37 }
 0x2cb   : > { %976 = vrcp.f32 %v1322_v42  ;;  %v535_v16 = vor.u32 1.1754944e-38, %v534_v49  ;;  %v579_v26 = vand.u32 2147483648, %v1322_v42  ;;  %v564_v28 = vand.u32 2147483648, %v1320_v41 }
 0x2cc   : > { %978 = vrcp.f32 %v1324_v43  ;;  %v562_v44 = vand.u32 2147483647, %v1320_v41  ;;  %v577_v46 = vand.u32 2147483647, %v1322_v42  ;;  %v609_v55 = vand.u32 2147483648, %v1326_v61 }
 0x2cd   : > { %980 = vrcp.f32 %v1326_v61  ;;  %v594_v63 = vand.u32 2147483648, %v1324_v43 }
 0x2ce   : > { %v971_v47 = vpop.eup %970  ;;  %982 = vrcp.f32 %v1332_v48 }
 0x2cf   : > { %v973_v50 = vpop.eup %972  ;;  %v524_v52 = vmul.f32 %v971_v47, %v507_v39  ;;  %vm529_vm14 = vweird.f32 %v971_v47  ;;  %984 = vrcp.f32 %v1334_v51 }
 0x2d0   : > { %v1336_v53 = vpop.eup %974  ;;  %v539_v54 = vmul.f32 %v973_v50, %v508_v40  ;;  %vm544_vm15 = vweird.f32 %v973_v50  ;;  %vm530_vm1 = vmor %vm528_vm12, %vm529_vm14  ;;  %vm573_vm12 = vweird.f32 %v1322_v42  ;;  %vm578_vm14 = vcmp.eq.f32.partialorder %v577_v46, 8.507059e+37 }
 0x2d1   : > { %v1342_v57 = vpop.eup %976  ;;  %v525_v62 = vsub.f32 1.0, %v524_v52  ;;  %v554_v0 = vmul.f32 %v1336_v53, %v1320_v41  ;;  %vm559_vm9 = vweird.f32 %v1336_v53  ;;  %vm545_vm8 = vmor %vm543_vm10, %vm544_vm15  ;;  %vm558_vm10 = vweird.f32 %v1320_v41 }
 0x2d2   : > { %v1350_v14 = vpop.eup %978  ;;  %v540_v15 = vsub.f32 1.0, %v539_v54  ;;  %v569_v17 = vmul.f32 %v1342_v57, %v1322_v42  ;;  %vm574_vm7 = vweird.f32 %v1342_v57  ;;  %v565_v41 = vor.u32 1.1754944e-38, %v564_v28 }
 0x2d3   : > { %v1355_v18 = vpop.eup %980  ;;  %v526_v19 = vmul.f32 %v971_v47, %v525_v62  ;;  %v555_v20 = vsub.f32 1.0, %v554_v0  ;;  %v584_v21 = vmul.f32 %v1350_v14, %v1324_v43  ;;  %v580_v52 = vor.u32 1.1754944e-38, %v579_v26 }
 0x2d4   : > { %v541_v22 = vmul.f32 %v973_v50, %v540_v15  ;;  %v570_v23 = vsub.f32 1.0, %v569_v17  ;;  %v599_v24 = vmul.f32 %v1355_v18, %v1326_v61  ;;  %v1371_v34 = vpop.eup %982  ;;  %vm604_vm15 = vweird.f32 %v1355_v18 }
 0x2d5   : > { %v527_v25 = vadd.f32 %v971_v47, %v526_v19  ;;  %v556_v27 = vmul.f32 %v1336_v53, %v555_v20  ;;  %v585_v33 = vsub.f32 1.0, %v584_v21  ;;  %v1390_v49 = vpop.eup %984  ;;  %v629_v42 = vmul.f32 %v1371_v34, %v1332_v48 }
 0x2d6   : > { %v542_v29 = vadd.f32 %v973_v50, %v541_v22  ;;  %v571_v30 = vmul.f32 %v1342_v57, %v570_v23  ;;  %v600_v38 = vsub.f32 1.0, %v599_v24  ;;  %v607_v20 = vand.u32 2147483647, %v1326_v61 }
 0x2d7   : > { %v531_v31 = vsel %vm530_vm1, %v971_v47, %v527_v25  ;;  %v557_v32 = vadd.f32 %v1336_v53, %v556_v27  ;;  %v630_v0 = vsub.f32 1.0, %v629_v42  ;;  %vm588_vm1 = vweird.f32 %v1324_v43 }
 0x2d8   : > { %v546_v35 = vsel %vm545_vm8, %v973_v50, %v542_v29  ;;  %v536_v36 = vsel %vm1344_vm13, %v535_v16, %v531_v31  ;;  %v572_v37 = vadd.f32 %v1342_v57, %v571_v30  ;;  %vm560_vm8 = vmor %vm558_vm10, %vm559_vm9  ;;  %v601_v50 = vmul.f32 %v1355_v18, %v600_v38 }
 0x2d9   : > { %v551_v39 = vsel %vm1338_vm11, %v550_v60, %v546_v35  ;;  %v537_v40 = vmul.f32 %v1285_v59, %v536_v36  ;;  %vm575_vm13 = vmor %vm573_vm12, %vm574_vm7  ;;  %v561_v47 = vsel %vm560_vm8, %v1336_v53, %v557_v32  ;;  %v586_v59 = vmul.f32 %v1350_v14, %v585_v33 }
 0x2da   : > { %v552_v45 = vmul.f32 %v1282_v58, %v551_v39  ;;  %v576_v58 = vsel %vm575_vm13, %v1342_v57, %v572_v37  ;;  %vm563_vm11 = vcmp.eq.f32.partialorder %v562_v44, 8.507059e+37  ;;  %vm589_vm7 = vweird.f32 %v1350_v14 }
 0x2db   : > { %645 = vperm.xlu1 %934, %v537_v40   ;;  %v566_v54 = vsel %vm563_vm11, %v565_v41, %v561_v47  ;;  %v581_v53 = vsel %vm578_vm14, %v580_v52, %v576_v58  ;;  %v587_v60 = vadd.f32 %v1350_v14, %v586_v59  ;;  %v614_v57 = vmul.f32 %v1390_v49, %v1334_v51  ;;  %vm590_vm10 = vmor %vm588_vm1, %vm589_vm7 }
 0x2dc   : > { %650 = vperm.xlu0 %933, %v552_v45   ;;  %v602_v62 = vadd.f32 %v1355_v18, %v601_v50  ;;  %v567_v15 = vmul.f32 %v1280_v56, %v566_v54  ;;  %v592_v16 = vand.u32 2147483647, %v1324_v43  ;;  %v582_v19 = vmul.f32 %v1289_v1, %v581_v53 }
 0x2dd   : > { %v615_v17 = vsub.f32 1.0, %v614_v57  ;;  %vm603_vm9 = vweird.f32 %v1326_v61  ;;  %v591_v21 = vsel %vm590_vm10, %v1350_v14, %v587_v60  ;;  %v595_v23 = vor.u32 1.1754944e-38, %v594_v63 }
 0x2de   : > { %vm605_vm12 = vmor %vm603_vm9, %vm604_vm15  ;;  %v631_v43 = vmul.f32 %v1371_v34, %v630_v0  ;;  %v610_v24 = vor.u32 1.1754944e-38, %v609_v55  ;;  %vm593_vm8 = vcmp.eq.f32.partialorder %v592_v16, 8.507059e+37  ;;  %vm608_vm13 = vcmp.eq.f32.partialorder %v607_v20, 8.507059e+37 }
 0x2df   : > { %v616_v22 = vmul.f32 %v1390_v49, %v615_v17  ;;  %v606_v56 = vsel %vm605_vm12, %v1355_v18, %v602_v62  ;;  %v596_v1 = vsel %vm593_vm8, %v595_v23, %v591_v21  ;;  %vm619_vm11 = vweird.f32 %v1390_v49 }
 0x2e0   : > { %v611_v25 = vsel %vm608_vm13, %v610_v24, %v606_v56  ;;  %v632_v26 = vadd.f32 %v1371_v34, %v631_v43  ;;  %vm634_vm14 = vweird.f32 %v1371_v34  ;;  %v624_v14 = vand.u32 2147483648, %v1334_v51 }
 0x2e1   : > { %v617_v61 = vadd.f32 %v1390_v49, %v616_v22  ;;  %v597_v18 = vmul.f32 %v1291_v10, %v596_v1  ;;  %v639_v27 = vand.u32 2147483648, %v1332_v48  ;;  %vm618_vm7 = vweird.f32 %v1334_v51 }
 0x2e2   : > { %v622_v28 = vand.u32 2147483647, %v1334_v51  ;;  %v612_v29 = vmul.f32 %v1298_v12, %v611_v25  ;;  %vm633_vm15 = vweird.f32 %v1332_v48  ;;  %v637_v30 = vand.u32 2147483647, %v1332_v48  ;;  %vm620_vm1 = vmor %vm618_vm7, %vm619_vm11 }
 0x2e3   : > { %655 = vperm.xlu1 %934, %v567_v15   ;;  %vm635_vm9 = vmor %vm633_vm15, %vm634_vm14  ;;  %v621_v31 = vsel %vm620_vm1, %v1390_v49, %v617_v61  ;;  %v625_v32 = vor.u32 1.1754944e-38, %v624_v14  ;;  %v640_v33 = vor.u32 1.1754944e-38, %v639_v27 }
 0x2e4   : > { %660 = vperm.xlu0 %933, %v582_v19   ;;  %v636_v10 = vsel %vm635_vm9, %v1371_v34, %v632_v26  ;;  %vm623_vm10 = vcmp.eq.f32.partialorder %v622_v28, 8.507059e+37  ;;  %vm638_vm12 = vcmp.eq.f32.partialorder %v637_v30, 8.507059e+37 }
 0x2e5   : > { %v626_v35 = vsel %vm623_vm10, %v625_v32, %v621_v31  ;;  %v641_v51 = vsel %vm638_vm12, %v640_v33, %v636_v10 }
 0x2e6   : > { %v627_v12 = vmul.f32 %v1300_v13, %v626_v35  ;;  %v642_v36 = vmul.f32 %v1294_v11, %v641_v51 }
 0x2eb   : > { %665 = vperm.xlu1 %934, %v597_v18  }
 0x2ec   : > { %670 = vperm.xlu0 %933, %v612_v29  }
 0x2f3   : > { %675 = vperm.xlu1 %934, %v627_v12  }
 0x2f4   : > { %680 = vperm.xlu0 %933, %v642_v36  }
 0x34d   : > { %v646_v48 = vpop.permute.xlu1 %645 }
 0x34e   : > { %v651_v37 = vpop.permute.xlu0 %650  ;;  %v683_v38 = vmul.f32 %v646_v48, %v1220_v2 }
 0x34f   : > { %v684_v39 = vmul.f32 %v651_v37, %v1222_v3 }
 0x350   : > { %v691_v34 = vsel %vm280_vm0, %v683_v38, 0.0 }
 0x351   : > { %v698_v40 = vsel %vm280_vm0, %v684_v39, 0.0  ;;  %v692_v44 = vrot.slane %v691_v34, 4 }
 0x352   : > { %v699_v45 = vrot.slane %v698_v40, 4 }
 0x353   : > { %v693_v59 = vadd.f32 %v692_v44, %v691_v34 }
 0x354   : > { %v700_v49 = vadd.f32 %v699_v45, %v698_v40 }
 0x355   : > { %v656_v46 = vpop.permute.xlu1 %655  ;;  %v694_v50 = vrot.slane %v693_v59, 2 }
 0x356   : > { %v661_v47 = vpop.permute.xlu0 %660  ;;  %v685_v13 = vmul.f32 %v656_v46, %v1224_v4  ;;  %v701_v52 = vrot.slane %v700_v49, 2 }
 0x357   : > { %v686_v11 = vmul.f32 %v661_v47, %v1226_v5  ;;  %v695_v4 = vadd.f32 %v694_v50, %v693_v59 }
 0x358   : > { %v705_v58 = vsel %vm280_vm0, %v685_v13, 0.0  ;;  %v702_v5 = vadd.f32 %v701_v52, %v700_v49 }
 0x359   : > { %v712_v2 = vsel %vm280_vm0, %v686_v11, 0.0  ;;  %v706_v41 = vrot.slane %v705_v58, 4  ;;  %v696_v20 = vrot.slane %v695_v4, 1 }
 0x35a   : > { %v713_v3 = vrot.slane %v712_v2, 4  ;;  %v703_v22 = vrot.slane %v702_v5, 1 }
 0x35b   : > { %v707_v42 = vadd.f32 %v706_v41, %v705_v58  ;;  %v697_v61 = vadd.f32 %v696_v20, %v695_v4 }
 0x35c   : > { %v714_v54 = vadd.f32 %v713_v3, %v712_v2  ;;  %v704_v18 = vadd.f32 %v703_v22, %v702_v5 }
 0x35d   : > { %v708_v55 = vrot.slane %v707_v42, 2  ;;  %v666_v53 = vpop.permute.xlu1 %665 }
 0x35e   : > { %v671_v60 = vpop.permute.xlu0 %670  ;;  %v687_v57 = vmul.f32 %v666_v53, %v1228_v6  ;;  %v715_v63 = vrot.slane %v714_v54, 2 }
 0x35f   : > { %v688_v62 = vmul.f32 %v671_v60, %v1230_v7  ;;  %v709_v15 = vadd.f32 %v708_v55, %v707_v42 }
 0x360   : > { %v719_v0 = vsel %vm280_vm0, %v687_v57, 0.0  ;;  %v716_v56 = vadd.f32 %v715_v63, %v714_v54 }
 0x361   : > { %v726_v16 = vsel %vm280_vm0, %v688_v62, 0.0  ;;  %v720_v17 = vrot.slane %v719_v0, 4  ;;  %v710_v43 = vrot.slane %v709_v15, 1 }
 0x362   : > { %v727_v19 = vrot.slane %v726_v16, 4  ;;  %v717_v27 = vrot.slane %v716_v56, 1 }
 0x363   : > { %v721_v21 = vadd.f32 %v720_v17, %v719_v0  ;;  %v711_v30 = vadd.f32 %v710_v43, %v709_v15 }
 0x364   : > { %v728_v23 = vadd.f32 %v727_v19, %v726_v16  ;;  %v718_v51 = vadd.f32 %v717_v27, %v716_v56 }
 0x365   : > { %v722_v24 = vrot.slane %v721_v21, 2  ;;  %v676_v6 = vpop.permute.xlu1 %675 }
 0x366   : > { %v729_v1 = vrot.slane %v728_v23, 2  ;;  %v681_v25 = vpop.permute.xlu0 %680  ;;  %v689_v7 = vmul.f32 %v676_v6, %v1232_v8  ;;  %v755_v8 = vsel %vm395_vm2, %v704_v18, %v697_v61  ;;  %vm1505_vm2 = vcmask 1046534  }
 0x367   : > { %v723_v26 = vadd.f32 %v722_v24, %v721_v21  ;;  %v690_v14 = vmul.f32 %v681_v25, %v1234_v9  ;;  %v756_v9 = vsel %vm397_vm3, %v711_v30, %v755_v8  ;;  %vm1506_vm3 = vcmask 1047559  }
 0x368   : > { %v730_v28 = vadd.f32 %v729_v1, %v728_v23  ;;  %v733_v29 = vsel %vm280_vm0, %v689_v7, 0.0  ;;  %v757_v40 = vsel %vm399_vm4, %v718_v51, %v756_v9 }
 0x369   : > { %v724_v31 = vrot.slane %v723_v26, 1  ;;  %v740_v10 = vsel %vm280_vm0, %v690_v14, 0.0  ;;  %v734_v32 = vrot.slane %v733_v29, 4 }
 0x36a   : > { %v741_v33 = vrot.slane %v740_v10, 4  ;;  %v731_v12 = vrot.slane %v730_v28, 1 }
 0x36b   : > { %v735_v35 = vadd.f32 %v734_v32, %v733_v29  ;;  %v725_v48 = vadd.f32 %v724_v31, %v723_v26 }
 0x36c   : > { %v742_v36 = vadd.f32 %v741_v33, %v740_v10  ;;  %v732_v34 = vadd.f32 %v731_v12, %v730_v28 }
 0x36d   : > { %v736_v37 = vrot.slane %v735_v35, 2  ;;  %v758_v45 = vsel %vm401_vm5, %v725_v48, %v757_v40 }
 0x36e   : > { %v743_v38 = vrot.slane %v742_v36, 2  ;;  %v759_v11 = vsel %vm403_vm6, %v732_v34, %v758_v45 }
 0x36f   : > { %v737_v39 = vadd.f32 %v736_v37, %v735_v35 }
 0x370   : > { %v744_v44 = vadd.f32 %v743_v38, %v742_v36 }
 0x371   : > { %v738_v46 = vrot.slane %v737_v39, 1 }
 0x372   : > { %v745_v47 = vrot.slane %v744_v44, 1 }
 0x373   : > { %v739_v13 = vadd.f32 %v738_v46, %v737_v39 }
 0x374   : > { %v746_v59 = vadd.f32 %v745_v47, %v744_v44 }
 0x375   : > { %v760_v49 = vsel %vm1505_vm2, %v739_v13, %v759_v11 }
 0x376   : > { %v761_v58 = vsel %vm1506_vm3, %v746_v59, %v760_v49 }
 0x377   : > { %763 = vst.msk [vmem:[%s245_s4] sm:$0xff] %vm280_vm0, %v761_v58 }
 0x378   : > { %1043 = shalt.err (!%p1040_p4)
}
 0x379   : > { %886 = dma.vmem_to_hbm [thread:$0]  (%p1170_p11), %s778_s15, 128, %s780_s19, %s765_s17  }
 0x37a PF: > { %s791_s12 = sand.u32 1, %s1070_s20   ;;  %p1507_p7 = scmp.ge.s32.totalorder %s1082_s23, 2 }
 0x37b   : > { %s792_s29 = scalar_lea.sflag [#allocation5], %s791_s12 }
 0x37c   : > { %p893_p5 = pnand %p1507_p7, %p1174_p12 }
 0x37e   : > { %p894_p8 = pneg %p893_p5 }
 0x380   : > { %1065 = dma.done.wait (%p894_p8), %s792_s29, 128  }
 0x381   : > { %1067 = vsyncadd (%p894_p8), %s792_s29, 4294967168  ;;  %p19_p10 = scmp.ge.s32.totalorder %s1145_s25, 4   ;;  %s1508_s20 = smov %s1074_s21 }
 0x382   : > { %s1509_s21 = smov %s1078_s22  ;;  %s1510_s22 = smov %s1157_s28 }
 0x383   : > { %s1511_s23 = smov %s1145_s25  ;;  %21 = sbr.rel (!%p19_p10) target bundleno = 7 (0x7), region = 85 }
 0x388   :  { %798 = vsyncpa [#allocation4], 1 }
 0x389   :  { %800 = vsyncpa [#allocation4 + $0x1], 1 }
 0x38a   :  { %801 = vsyncpa [#allocation5], 1 }
 0x38b   :  { %803 = vsyncpa [#allocation5 + $0x1], 1 }

</bundles_post_ra>
